<compile_context>
chip_gen: v6e
topology: v6e:2x2x1
jax: 0.10.0
libtpu: 0.0.40
codegen_flags: <defaults>
</compile_context>

<pallas_src>
import functools

import jax
import jax.numpy as jnp
from jax import lax
from jax.experimental import pallas as pl
from jax.experimental.pallas import tpu as pltpu


# --------------------------------------------------------------------------- #
# Stateless counter-based PRNG (plain int32 jnp ops -> lowers in Mosaic and in
# interpret mode; exact/deterministic, so the same helper doubles as reference).
# --------------------------------------------------------------------------- #

def _i32c(v):
    """Python int -> int32 constant (two's-complement wrap for values >= 2^31)."""
    v &= 0xFFFFFFFF
    if v >= 0x80000000:
        v -= 1 << 32
    return jnp.int32(v)


def _shr(x, n):
    """Logical right shift on int32: arithmetic shift, then mask the sign smear."""
    return (x >> n) & ((1 << (32 - n)) - 1)


def _uniform_hash(seed, row, col):
    """splitmix/murmur-style mix of (seed, row, col) -> uniform float32 in [0, 1)."""
    h = row * _i32c(0x9E3779B1) + col * _i32c(0x85EBCA77) + seed
    h = (h ^ _shr(h, 16)) * _i32c(0x7FEB352D)
    h = (h ^ _shr(h, 15)) * _i32c(0x846CA68B)
    h = h ^ _shr(h, 16)
    # top 23 bits -> exactly representable float32 in [0, 1)
    return _shr(h, 9).astype(jnp.float32) * jnp.float32(1.0 / (1 << 23))


# --------------------------------------------------------------------------- #
# Fused kernel: (dropout on the x tile) -> MXU matmul accumulate -> +bias, ReLU
# --------------------------------------------------------------------------- #

def _dense_kernel(seed_ref, *refs, training, p, k_total, has_bias,
                  has_scratch, cast_bf16):
    x_ref, w_ref = refs[0], refs[1]
    pos = 2
    b_ref = None
    if has_bias:
        b_ref = refs[pos]
        pos += 1
    o_ref = refs[pos]
    pos += 1
    # f32 output: accumulate directly in the resident output block; otherwise
    # accumulate in a f32 VMEM scratch and cast on finalize.
    acc_ref = refs[pos] if has_scratch else o_ref

    i = pl.program_id(0)
    k = pl.program_id(2)
    nk = pl.num_programs(2)

    @pl.when(k == 0)
    def _init():
        acc_ref[...] = jnp.zeros_like(acc_ref)

    tm, tk = x_ref.shape
    x = x_ref[...]

    mask_k_edge = (k_total % tk) != 0                 # static flag
    if training or mask_k_edge:
        col = lax.broadcasted_iota(jnp.int32, (tm, tk), 1) + k * tk

    if training:
        # Inverted dropout fused on the x tile.  The mask depends only on the
        # global element index (not on j / the tiling), scale applied in f32.
        row = lax.broadcasted_iota(jnp.int32, (tm, tk), 0) + i * tm
        u = _uniform_hash(seed_ref[0], row, col)
        keep = u >= jnp.float32(p)
        scale = jnp.float32(1.0 / (1.0 - p))
        x = jnp.where(keep, x.astype(jnp.float32) * scale, jnp.float32(0.0))

    if mask_k_edge:
        # Ragged K edge: zero columns past k_total instead of padding in HBM.
        x = jnp.where(col < k_total, x, jnp.zeros_like(x))

    mxu_dtype = jnp.bfloat16 if cast_bf16 else x_ref.dtype
    x = x.astype(mxu_dtype)
    w = w_ref[...].astype(mxu_dtype) if cast_bf16 else w_ref[...]

    acc_ref[...] += jnp.dot(x, w, preferred_element_type=jnp.float32)

    @pl.when(k == nk - 1)
    def _finalize():
        y = acc_ref[...]
        if has_bias:
            y = y + b_ref[...]                         # bias kept in float32
        o_ref[...] = jnp.maximum(y, 0.0).astype(o_ref.dtype)   # ReLU


# --------------------------------------------------------------------------- #
# Trace-time hardware queries (defensive: fall back to conservative defaults)
# --------------------------------------------------------------------------- #

def _tpu_info():
    try:
        return pltpu.get_tpu_info()
    except Exception:
        return None


def _vmem_capacity_bytes():
    info = _tpu_info()
    try:
        cap = int(getattr(info, "vmem_capacity_bytes"))
    except Exception:
        cap = 0
    if cap <= 0:
        cap = 64 << 20          # assume the smallest generation (v7x) if unknown
    return cap


def _tensorcores_per_chip():
    info = _tpu_info()
    if info is not None:
        for name in ("tensorcores_per_chip", "num_tensorcores", "num_cores",
                     "core_count"):
            v = getattr(info, name, None)
            try:
                v = int(v)
            except Exception:
                continue
            if v >= 1:
                return v
    return 1                    # conservative: no cross-core row split


# --------------------------------------------------------------------------- #
# Tile selection (VMEM-budgeted, weight-resident fast path)
# --------------------------------------------------------------------------- #

def _round_down(v, align):
    return max(align, (v // align) * align)


def _select_tiles(N, K, D_out, x_isize, w_isize, out_isize, has_scratch, has_bias):
    vmem_cap = _vmem_capacity_bytes()
    budget = min(28 << 20, vmem_cap // 3)     # double-buffered working-set cap

    # Weight-resident fast path: a full-array weight block has a constant block
    # index, so Pallas fetches it from HBM exactly once for the whole kernel.
    if K * D_out * w_isize <= (4 << 20):
        tk, tn = K, D_out
    else:
        tk = K if K <= 1024 else 1024
        tn = D_out if D_out <= 1024 else 1024
    tm = N if N <= 512 else 512

    def footprint(tm_, tk_, tn_):
        f = 2 * tm_ * tk_ * x_isize           # x tiles   (double-buffered)
        f += 2 * tk_ * tn_ * w_isize          # weight tiles
        f += 2 * tm_ * tn_ * out_isize        # output tiles
        if has_scratch:
            f += tm_ * tn_ * 4                # f32 accumulator scratch
        if has_bias:
            f += 2 * tn_ * 4
        return f

    while footprint(tm, tk, tn) > budget:
        if tm > 128 and N > 128:
            tm = max(128, _round_down(tm // 2, 16))
        elif tk > 256:
            tk = _round_down(tk // 2, 128)
        elif tn > 256:
            tn = _round_down(tn // 2, 128)
        else:
            break

    vmem_limit = int(min(max(32 << 20, footprint(tm, tk, tn) + (8 << 20)),
                         max(32 << 20, vmem_cap - (8 << 20))))
    return tm, tk, tn, vmem_limit


# --------------------------------------------------------------------------- #
# Wrapper: ReLU(dropout(x, p) @ W (+ b))
# --------------------------------------------------------------------------- #

def dense_forward(x, weight, bias=None, *, training=False, p=0.7, seed=0,
                  cast_to_bf16=False):
    """Pallas equivalent of Dense.forward.

    cast_to_bf16=True feeds bf16 operands to the MXU (f32 accumulation) --
    a throughput/accuracy trade-off for f32 inputs on v6e/v7x.
    """
    N, K = x.shape
    Kw, D_out = weight.shape
    assert K == Kw, "x / weight inner-dimension mismatch"

    p = float(p)
    training = bool(training) and p > 0.0
    if training and p >= 1.0:
        x = jnp.zeros_like(x)      # p == 1 drops everything; no mask needed
        training = False

    out_dtype = jnp.result_type(x.dtype, weight.dtype)
    has_bias = bias is not None
    has_scratch = out_dtype != jnp.float32

    tm, tk, tn, vmem_limit = _select_tiles(
        N, K, D_out, x.dtype.itemsize, weight.dtype.itemsize,
        jnp.dtype(out_dtype).itemsize, has_scratch, has_bias)

    ni, nj, nk = pl.cdiv(N, tm), pl.cdiv(D_out, tn), pl.cdiv(K, tk)

    # v7x (2 TensorCores/chip): if the grid has only a single parallel step,
    # split the rows so each core gets an independent range.  v5e/v6e report a
    # single core and keep the single-step grid (no extra overhead).
    if ni * nj == 1 and N >= 32 and _tensorcores_per_chip() >= 2:
        tm = max(16, ((-(-N // 2) + 15) // 16) * 16)
        ni = pl.cdiv(N, tm)

    kernel = functools.partial(
        _dense_kernel, training=training, p=p, k_total=K, has_bias=has_bias,
        has_scratch=has_scratch, cast_bf16=bool(cast_to_bf16))

    in_specs = [pl.BlockSpec((tm, tk), lambda i, j, k, s: (i, k)),
                pl.BlockSpec((tk, tn), lambda i, j, k, s: (k, j))]
    inputs = [x, weight]
    if has_bias:
        # bias stays float32 end-to-end (added to the f32 accumulator)
        in_specs.append(pl.BlockSpec((1, tn), lambda i, j, k, s: (0, j)))
        inputs.append(jnp.asarray(bias, dtype=jnp.float32).reshape(1, D_out))

    scratch_shapes = [pltpu.VMEM((tm, tn), jnp.float32)] if has_scratch else []

    seed_i32 = ((int(seed) & 0xFFFFFFFF) ^ 0x80000000) - 0x80000000
    seed_arr = jnp.asarray([seed_i32], dtype=jnp.int32)

    return pl.pallas_call(
        kernel,
        out_shape=jax.ShapeDtypeStruct((N, D_out), out_dtype),
        grid_spec=pltpu.PrefetchScalarGridSpec(
            num_scalar_prefetch=1,
            grid=(ni, nj, nk),
            in_specs=in_specs,
            out_specs=pl.BlockSpec((tm, tn), lambda i, j, k, s: (i, j)),
            scratch_shapes=scratch_shapes,
        ),
        compiler_params=pltpu.CompilerParams(
            dimension_semantics=("parallel", "parallel", "arbitrary"),
            vmem_limit_bytes=vmem_limit),
    )(seed_arr, *inputs)


def glorot(key, shape):
    fan_in, fan_out = shape
    limit = (6.0 / (fan_in + fan_out)) ** 0.5
    return jax.random.uniform(key, shape, minval=-limit, maxval=limit,
                              dtype=jnp.float32)


if __name__ == "__main__":
    key = jax.random.PRNGKey(0)
    kx, kw, kb = jax.random.split(key, 3)

    N, input_dim, output_dim = 64, 128, 256
    p, seed = 0.7, 42

    x = jax.random.normal(kx, (N, input_dim), dtype=jnp.float32)
    weight = glorot(kw, (input_dim, output_dim))   # Parameter(input_dim, output_dim)

    # ---- eval mode (dropout is identity), bias=False as in the module default
    out = dense_forward(x, weight, None, training=False, p=p)
    jax.block_until_ready(out)
    ref = jnp.maximum(x @ weight, 0.0)
    assert out.shape == (N, output_dim)
    assert jnp.allclose(out, ref, atol=2e-2, rtol=2e-2), "eval-mode mismatch"

    # ---- bias path (module also supports bias=True)
    bias = 0.1 * jax.random.normal(kb, (output_dim,), dtype=jnp.float32)
    out_b = dense_forward(x, weight, bias, training=False, p=p)
    jax.block_until_ready(out_b)
    ref_b = jnp.maximum(x @ weight + bias, 0.0)
    assert jnp.allclose(out_b, ref_b, atol=2e-2, rtol=2e-2), "bias-path mismatch"

    # ---- training mode (fused dropout); reference replays the same hash mask
    out_t = dense_forward(x, weight, None, training=True, p=p, seed=seed)
    jax.block_until_ready(out_t)
    rows = jnp.arange(N, dtype=jnp.int32).reshape(N, 1)
    cols = jnp.arange(input_dim, dtype=jnp.int32).reshape(1, input_dim)
    u = _uniform_hash(jnp.int32(seed), rows, cols)
    x_drop = jnp.where(u >= jnp.float32(p),
                       x * jnp.float32(1.0 / (1.0 - p)), jnp.float32(0.0))
    ref_t = jnp.maximum(x_drop @ weight, 0.0)
    assert out_t.shape == (N, output_dim)
    assert bool(jnp.all(jnp.isfinite(out_t)))
    assert jnp.allclose(out_t, ref_t, atol=5e-2, rtol=5e-2), "training-mode mismatch"

    print("KERNEL_OK")
</pallas_src>

<mosaic_0001>
module attributes {stable_mosaic.version = 11 : i64} {
  func.func @_dense_kernel(%arg0: i32, %arg1: i32, %arg2: i32, %arg3: memref<1xi32, #tpu.memory_space<smem>>, %arg4: memref<64x128xf32, #tpu.memory_space<vmem>>, %arg5: memref<128x256xf32, #tpu.memory_space<vmem>>, %arg6: memref<64x256xf32, #tpu.memory_space<vmem>>) attributes {dimension_semantics = [#tpu.dimension_semantics<parallel>, #tpu.dimension_semantics<parallel>, #tpu.dimension_semantics<arbitrary>], iteration_bounds = array<i64: 1, 1, 1>, scalar_prefetch = 1 : i64, scratch_operands = 0 : i64, tpu.core_type = #tpu.core_type<tc>, window_params = [{transform_indices = @transform_0, window_bounds = array<i64: 64, 128>}, {transform_indices = @transform_1, window_bounds = array<i64: 128, 256>}, {transform_indices = @transform_2, window_bounds = array<i64: 64, 256>}]} {
    %c0_i32 = arith.constant 0 : i32
    %0 = arith.cmpi eq, %arg2, %c0_i32 : i32
    %1 = arith.extui %0 : i1 to i32
    %c0_i32_0 = arith.constant 0 : i32
    %2 = arith.cmpi ne, %1, %c0_i32_0 : i32
    scf.if %2 {
      %cst_10 = arith.constant 0.000000e+00 : f32
      %12 = vector.broadcast %cst_10 : f32 to vector<64x256xf32>
      %c0_11 = arith.constant 0 : index
      %c0_12 = arith.constant 0 : index
      %13 = vector.load %arg6[%c0_11, %c0_12] : memref<64x256xf32, #tpu.memory_space<vmem>>, vector<64x256xf32>
      tpu.vector_store %arg6[%c0_11, %c0_12], %12 {strides = array<i32>} : memref<64x256xf32, #tpu.memory_space<vmem>>, vector<64x256xf32>,
    } else {
    }
    %c0 = arith.constant 0 : index
    %c0_1 = arith.constant 0 : index
    %3 = vector.load %arg4[%c0, %c0_1] : memref<64x128xf32, #tpu.memory_space<vmem>>, vector<64x128xf32>
    %c0_2 = arith.constant 0 : index
    %c0_3 = arith.constant 0 : index
    %4 = vector.load %arg5[%c0_2, %c0_3] : memref<128x256xf32, #tpu.memory_space<vmem>>, vector<128x256xf32>
    %c0_4 = arith.constant 0 : index
    %c0_5 = arith.constant 0 : index
    %5 = vector.load %arg6[%c0_4, %c0_5] : memref<64x256xf32, #tpu.memory_space<vmem>>, vector<64x256xf32>
    %cst = arith.constant dense<0.000000e+00> : vector<64x256xf32>
    %6 = tpu.matmul %3, %4, %cst {dimension_numbers = #tpu.dot_dimension_numbers<[1], [0], [0], [1], [0, 0, 1, 1], [], []>} : vector<64x128xf32>, vector<128x256xf32>, vector<64x256xf32> -> vector<64x256xf32>
    %7 = arith.addf %5, %6 : vector<64x256xf32>
    %c0_6 = arith.constant 0 : index
    %c0_7 = arith.constant 0 : index
    %8 = vector.load %arg6[%c0_6, %c0_7] : memref<64x256xf32, #tpu.memory_space<vmem>>, vector<64x256xf32>
    tpu.vector_store %arg6[%c0_6, %c0_7], %7 {strides = array<i32>} : memref<64x256xf32, #tpu.memory_space<vmem>>, vector<64x256xf32>,
    %c0_i32_8 = arith.constant 0 : i32
    %9 = arith.cmpi eq, %arg2, %c0_i32_8 : i32
    %10 = arith.extui %9 : i1 to i32
    %c0_i32_9 = arith.constant 0 : i32
    %11 = arith.cmpi ne, %10, %c0_i32_9 : i32
    scf.if %11 {
      %c0_10 = arith.constant 0 : index
      %c0_11 = arith.constant 0 : index
      %12 = vector.load %arg6[%c0_10, %c0_11] : memref<64x256xf32, #tpu.memory_space<vmem>>, vector<64x256xf32>
      %cst_12 = arith.constant 0.000000e+00 : f32
      %13 = vector.broadcast %cst_12 : f32 to vector<64x256xf32>
      %14 = arith.maximumf %12, %13 : vector<64x256xf32>
      %c0_13 = arith.constant 0 : index
      %c0_14 = arith.constant 0 : index
      %15 = vector.load %arg6[%c0_13, %c0_14] : memref<64x256xf32, #tpu.memory_space<vmem>>, vector<64x256xf32>
      tpu.vector_store %arg6[%c0_13, %c0_14], %14 {strides = array<i32>} : memref<64x256xf32, #tpu.memory_space<vmem>>, vector<64x256xf32>,
    } else {
    }
    return
  }
  func.func @transform_0(%arg0: i32, %arg1: i32, %arg2: i32, %arg3: memref<1xi32, #tpu.memory_space<smem>>) -> (i32, i32) {
    %c0_i32 = arith.constant 0 : i32
    return %arg0, %arg2 : i32, i32
  }
  func.func @transform_1(%arg0: i32, %arg1: i32, %arg2: i32, %arg3: memref<1xi32, #tpu.memory_space<smem>>) -> (i32, i32) {
    %c0_i32 = arith.constant 0 : i32
    return %arg2, %arg1 : i32, i32
  }
  func.func @transform_2(%arg0: i32, %arg1: i32, %arg2: i32, %arg3: memref<1xi32, #tpu.memory_space<smem>>) -> (i32, i32) {
    %c0_i32 = arith.constant 0 : i32
    return %arg0, %arg1 : i32, i32
  }
}

</mosaic_0001>

<bundles_post_ra>
// kernel: tpu_custom_call.1
= control target key start
LH: loop header
LB: loop body
LE: loop exit
PB: predicated region body
PF: predicated region fallthrough
CT: control target
= control target key end

     0   :  { %9 = vsyncpa [#allocation5], 0  ;;  %s489_s0 = inlined_call_operand.<no memory space> [shape: s32[1], index: 0, kind: input, shape index: {}]   ;;  %s490_s1 = inlined_call_operand.hbm [shape: f32[64,128], index: 1, kind: input, shape index: {}]   ;;  %s491_s2 = inlined_call_operand.hbm [shape: f32[128,256], index: 2, kind: input, shape index: {}]   ;;  %s492_s3 = inlined_call_operand.hbm [shape: f32[64,256], index: 3, kind: output, shape index: {}]  }
   0x1   :  { %10 = vsyncpa [#allocation8], 0 }
   0x2   :  { %11 = vsyncpa [#allocation6], 0  ;;  %s438_s12 = smov [#allocation4]  }
   0x3   :  { %s17_s13 = sshll.u32 %s438_s12, 4  ;;  %s18_s13 = int_to_ptr.vmem [resolvable:$true] %s17_s13 }
   0x4   :  { %s380_s14 = scalar_lea.vmem %s18_s13, 1024  ;;  %p385_p1 = scmp.lt.s32.totalorder %s18_s13, %s18_s13 }
   0x5   :  { %p381_p0 = scmp.ne.s32.totalorder %s18_s13, %s380_s14  ;;  %p386_p2 = scmp.lt.s32.totalorder %s380_s14, %s380_s14 }
   0x7   :  { %p387_p3 = por %p386_p2, %p385_p1 }
   0x9   :  { %p388_p4 = pnand %p387_p3, %p381_p0 }
   0xb   :  { %391 = shalt.err (!%p388_p4)
}
   0xc   :  { %s439_s0 = smov 128   ;;  %s440_s15 = smov 8  }
   0xd   :  { %23 = dma.hbm_to_vmem [thread:$0]  %s490_s1, 1024, %s18_s13, [#allocation5], %s439_s0, %s439_s0, %s440_s15  }
   0xe   :  { %s441_s18 = smov [#allocation7]  }
   0xf   :  { %s29_s19 = sshll.u32 %s441_s18, 4  ;;  %s30_s19 = int_to_ptr.vmem [resolvable:$true] %s29_s19 }
  0x10   :  { %s400_s20 = scalar_lea.vmem %s30_s19, 4096  ;;  %p405_p6 = scmp.lt.s32.totalorder %s30_s19, %s30_s19 }
  0x11   :  { %p401_p5 = scmp.ne.s32.totalorder %s30_s19, %s400_s20  ;;  %p406_p7 = scmp.lt.s32.totalorder %s400_s20, %s400_s20 }
  0x13   :  { %p407_p8 = por %p406_p7, %p405_p6 }
  0x15   :  { %p408_p9 = pnand %p407_p8, %p401_p5 }
  0x17   :  { %411 = shalt.err (!%p408_p9)
}
  0x18   :  { %s442_s21 = smov 256   ;;  %s443_s22 = smov 16  }
  0x19   :  { %35 = dma.hbm_to_vmem [thread:$0]  %s491_s2, 4096, %s30_s19, [#allocation8], %s442_s21, %s442_s21, %s443_s22  }
  0x1a   :  { %432 = dma.done.wait [#allocation5], 1024  }
  0x1b   :  { %433 = vsyncadd [#allocation5], 4294966272 }
  0x1c   :  { %434 = dma.done.wait [#allocation8], 4096  }
  0x1d   :  { %435 = vsyncadd [#allocation8], 4294963200  ;;  %v444_v0 = vmov 0.0   ;;  %v101_v1 = vld [vmem:[#allocation7 + $0xf8] sm:$0xff]  ;;  %v100_v2 = vld [vmem:[#allocation7 + $0xf0] sm:$0xff]  ;;  %s445_s1 = smov [#allocation9]  }
  0x1e   :  { %182 = vmatprep.mubr.f32.mxu0 %v444_v0  ;;  %206 = vmatprep.mubr.f32.mxu1 %v444_v0  ;;  %v99_v3 = vld [vmem:[#allocation7 + $0xe8] sm:$0xff]  ;;  %v98_v4 = vld [vmem:[#allocation7 + $0xe0] sm:$0xff]  ;;  %v97_v5 = vld [vmem:[#allocation7 + $0xd8] sm:$0xff]  ;;  %s319_s2 = sshll.u32 %s445_s1, 4  ;;  %s320_s2 = int_to_ptr.vmem [resolvable:$true] %s319_s2 }
  0x1f   :  { %118 = vmatprep.subr.mxu0 %v101_v1  ;;  %332 = vmatprep.subr.mxu1 %v101_v1  ;;  %v96_v6 = vld [vmem:[#allocation7 + $0xd0] sm:$0xff]  ;;  %v95_v7 = vld [vmem:[#allocation7 + $0xc8] sm:$0xff]  ;;  %v94_v8 = vld [vmem:[#allocation7 + $0xc0] sm:$0xff]  ;;  %s412_s25 = scalar_lea.vmem %s320_s2, 2048  ;;  %p417_p11 = scmp.lt.s32.totalorder %s320_s2, %s320_s2 }
  0x20   :  { %119 = vmatpush1.msra.mxu0 %v100_v2  ;;  %348 = vmatpush1.msra.mxu1 %v100_v2  ;;  %v93_v9 = vld [vmem:[#allocation7 + $0xb8] sm:$0xff]  ;;  %v92_v10 = vld [vmem:[#allocation7 + $0xb0] sm:$0xff]  ;;  %v91_v11 = vld [vmem:[#allocation7 + $0xa8] sm:$0xff]  ;;  %p413_p10 = scmp.ne.s32.totalorder %s320_s2, %s412_s25  ;;  %p418_p12 = scmp.lt.s32.totalorder %s412_s25, %s412_s25 }
  0x21   :  { %120 = vmatprep.subr.mxu0 %v99_v3  ;;  %333 = vmatprep.subr.mxu1 %v99_v3  ;;  %v90_v12 = vld [vmem:[#allocation7 + $0xa0] sm:$0xff]  ;;  %v89_v13 = vld [vmem:[#allocation7 + $0x98] sm:$0xff]  ;;  %v88_v14 = vld [vmem:[#allocation7 + $0x90] sm:$0xff] }
  0x22   :  { %121 = vmatpush1.msra.mxu0 %v98_v4  ;;  %349 = vmatpush1.msra.mxu1 %v98_v4  ;;  %v87_v15 = vld [vmem:[#allocation7 + $0x88] sm:$0xff]  ;;  %v86_v16 = vld [vmem:[#allocation7 + $0x80] sm:$0xff]  ;;  %v85_v17 = vld [vmem:[#allocation7 + $0x78] sm:$0xff]  ;;  %p419_p13 = por %p418_p12, %p417_p11 }
  0x23   :  { %122 = vmatprep.subr.mxu0 %v97_v5  ;;  %334 = vmatprep.subr.mxu1 %v97_v5  ;;  %v84_v18 = vld [vmem:[#allocation7 + $0x70] sm:$0xff]  ;;  %v83_v19 = vld [vmem:[#allocation7 + $0x68] sm:$0xff]  ;;  %v82_v20 = vld [vmem:[#allocation7 + $0x60] sm:$0xff] }
  0x24   :  { %123 = vmatpush1.msra.mxu0 %v96_v6  ;;  %350 = vmatpush1.msra.mxu1 %v96_v6  ;;  %v81_v21 = vld [vmem:[#allocation7 + $0x58] sm:$0xff]  ;;  %v80_v22 = vld [vmem:[#allocation7 + $0x50] sm:$0xff]  ;;  %v79_v23 = vld [vmem:[#allocation7 + $0x48] sm:$0xff]  ;;  %p420_p0 = pnand %p419_p13, %p413_p10 }
  0x25   :  { %124 = vmatprep.subr.mxu0 %v95_v7  ;;  %335 = vmatprep.subr.mxu1 %v95_v7  ;;  %v78_v24 = vld [vmem:[#allocation7 + $0x40] sm:$0xff]  ;;  %v77_v25 = vld [vmem:[#allocation7 + $0x38] sm:$0xff]  ;;  %v76_v26 = vld [vmem:[#allocation7 + $0x30] sm:$0xff] }
  0x26   :  { %125 = vmatpush1.msra.mxu0 %v94_v8  ;;  %351 = vmatpush1.msra.mxu1 %v94_v8  ;;  %v75_v27 = vld [vmem:[#allocation7 + $0x28] sm:$0xff]  ;;  %v74_v28 = vld [vmem:[#allocation7 + $0x20] sm:$0xff]  ;;  %v73_v29 = vld [vmem:[#allocation7 + $0x18] sm:$0xff] }
  0x27   :  { %126 = vmatprep.subr.mxu0 %v93_v9  ;;  %336 = vmatprep.subr.mxu1 %v93_v9  ;;  %v72_v30 = vld [vmem:[#allocation7 + $0x10] sm:$0xff]  ;;  %v71_v31 = vld [vmem:[#allocation7 + $0x8] sm:$0xff]  ;;  %v70_v32 = vld [vmem:[#allocation7] sm:$0xff] }
  0x28   :  { %127 = vmatpush1.msra.mxu0 %v92_v10  ;;  %352 = vmatpush1.msra.mxu1 %v92_v10  ;;  %v62_v33 = vld [vmem:[#allocation4] sm:$0xff]  ;;  %v63_v35 = vld [vmem:[#allocation4 + $0x8] sm:$0xff]  ;;  %v64_v37 = vld [vmem:[#allocation4 + $0x10] sm:$0xff] }
  0x29   :  { %128 = vmatprep.subr.mxu0 %v91_v11  ;;  %337 = vmatprep.subr.mxu1 %v91_v11  ;;  %v66_v34 = vld [vmem:[#allocation4 + $0x20] sm:$0xff]  ;;  %v67_v36 = vld [vmem:[#allocation4 + $0x28] sm:$0xff]  ;;  %v68_v38 = vld [vmem:[#allocation4 + $0x30] sm:$0xff] }
  0x2a   :  { %129 = vmatpush1.msra.mxu0 %v90_v12  ;;  %353 = vmatpush1.msra.mxu1 %v90_v12  ;;  %v65_v39 = vld [vmem:[#allocation4 + $0x18] sm:$0xff] }
  0x2b   :  { %130 = vmatprep.subr.mxu0 %v89_v13  ;;  %338 = vmatprep.subr.mxu1 %v89_v13  ;;  %v69_v40 = vld [vmem:[#allocation4 + $0x38] sm:$0xff] }
  0x2c   :  { %131 = vmatpush1.msra.mxu0 %v88_v14  ;;  %354 = vmatpush1.msra.mxu1 %v88_v14 }
  0x2d   :  { %132 = vmatprep.subr.mxu0 %v87_v15  ;;  %339 = vmatprep.subr.mxu1 %v87_v15 }
  0x2e   :  { %133 = vmatpush1.msra.mxu0 %v86_v16  ;;  %355 = vmatpush1.msra.mxu1 %v86_v16 }
  0x2f   :  { %134 = vmatprep.subr.mxu0 %v85_v17  ;;  %340 = vmatprep.subr.mxu1 %v85_v17 }
  0x30   :  { %135 = vmatpush1.msra.mxu0 %v84_v18  ;;  %356 = vmatpush1.msra.mxu1 %v84_v18 }
  0x31   :  { %136 = vmatprep.subr.mxu0 %v83_v19  ;;  %341 = vmatprep.subr.mxu1 %v83_v19 }
  0x32   :  { %137 = vmatpush1.msra.mxu0 %v82_v20  ;;  %357 = vmatpush1.msra.mxu1 %v82_v20 }
  0x33   :  { %138 = vmatprep.subr.mxu0 %v81_v21  ;;  %342 = vmatprep.subr.mxu1 %v81_v21 }
  0x34   :  { %139 = vmatpush1.msra.mxu0 %v80_v22  ;;  %358 = vmatpush1.msra.mxu1 %v80_v22 }
  0x35   :  { %140 = vmatprep.subr.mxu0 %v79_v23  ;;  %343 = vmatprep.subr.mxu1 %v79_v23 }
  0x36   :  { %141 = vmatpush1.msra.mxu0 %v78_v24  ;;  %359 = vmatpush1.msra.mxu1 %v78_v24 }
  0x37   :  { %142 = vmatprep.subr.mxu0 %v77_v25  ;;  %344 = vmatprep.subr.mxu1 %v77_v25 }
  0x38   :  { %143 = vmatpush1.msra.mxu0 %v76_v26  ;;  %360 = vmatpush1.msra.mxu1 %v76_v26 }
  0x39   :  { %144 = vmatprep.subr.mxu0 %v75_v27  ;;  %345 = vmatprep.subr.mxu1 %v75_v27 }
  0x3a   :  { %145 = vmatpush1.msra.mxu0 %v74_v28  ;;  %361 = vmatpush1.msra.mxu1 %v74_v28 }
  0x3b   :  { %146 = vmatprep.subr.mxu0 %v73_v29  ;;  %346 = vmatprep.subr.mxu1 %v73_v29 }
  0x3c   :  { %147 = vmatpush1.msra.mxu0 %v72_v30  ;;  %362 = vmatpush1.msra.mxu1 %v72_v30 }
  0x3d   :  { %148 = vmatprep.subr.mxu0 %v71_v31  ;;  %347 = vmatprep.subr.mxu1 %v71_v31 }
  0x3e   :  { %149 = vmatpush1.msra.mxu0 %v70_v32  ;;  %363 = vmatpush1.msra.mxu1 %v70_v32 }
  0x3f   :  { %183 = vmatmul.mubr.f32.vlgmr.msra.gmra.mxu0 %v62_v33  ;;  %207 = vmatmul.mubr.f32.vlgmr.msra.gmra.mxu1 %v66_v34 }
  0x40   :  { %188 = vmatprep.mubr.f32.mxu0 %v444_v0  ;;  %212 = vmatprep.mubr.f32.mxu1 %v444_v0 }
  0x43   :  { %189 = vmatmul.mubr.f32.gmra.mxu0 %v63_v35  ;;  %213 = vmatmul.mubr.f32.gmra.mxu1 %v67_v36 }
  0x44   :  { %194 = vmatprep.mubr.f32.mxu0 %v444_v0  ;;  %218 = vmatprep.mubr.f32.mxu1 %v444_v0 }
  0x47   :  { %195 = vmatmul.mubr.f32.gmra.mxu0 %v64_v37  ;;  %219 = vmatmul.mubr.f32.gmra.mxu1 %v68_v38 }
  0x48   :  { %200 = vmatprep.mubr.f32.mxu0 %v444_v0  ;;  %224 = vmatprep.mubr.f32.mxu1 %v444_v0 }
  0x4b   :  { %201 = vmatmul.mubr.f32.gmra.mxu0 %v65_v39  ;;  %225 = vmatmul.mubr.f32.gmra.mxu1 %v69_v40 }
  0xff   :  { %v184_v41 = vpop.f32.mrf.mxu0  ;;  %v208_v42 = vpop.f32.mrf.mxu1 }
 0x100   :  { %v282_v45 = vmax.f32 %v184_v41, 0.0  ;;  %v290_v46 = vmax.f32 %v208_v42, 0.0 }
 0x101   :  { %v186_v43 = vpop.f32.mrf.mxu0  ;;  %v210_v44 = vpop.f32.mrf.mxu1 }
 0x102   :  { %298 = vst [vmem:[#allocation9] sm:$0xff] %v282_v45  ;;  %306 = vst [vmem:[#allocation9 + $0x40] sm:$0xff] %v290_v46  ;;  %v283_v49 = vmax.f32 %v186_v43, 0.0  ;;  %v291_v50 = vmax.f32 %v210_v44, 0.0 }
 0x103   :  { %v190_v47 = vpop.f32.mrf.mxu0  ;;  %v214_v48 = vpop.f32.mrf.mxu1 }
 0x104   :  { %299 = vst [vmem:[#allocation9 + $0x8] sm:$0xff] %v283_v49  ;;  %307 = vst [vmem:[#allocation9 + $0x48] sm:$0xff] %v291_v50  ;;  %v284_v53 = vmax.f32 %v190_v47, 0.0  ;;  %v292_v54 = vmax.f32 %v214_v48, 0.0 }
 0x105   :  { %v192_v51 = vpop.f32.mrf.mxu0  ;;  %v216_v52 = vpop.f32.mrf.mxu1 }
 0x106   :  { %300 = vst [vmem:[#allocation9 + $0x10] sm:$0xff] %v284_v53  ;;  %308 = vst [vmem:[#allocation9 + $0x50] sm:$0xff] %v292_v54  ;;  %v285_v57 = vmax.f32 %v192_v51, 0.0  ;;  %v293_v58 = vmax.f32 %v216_v52, 0.0 }
 0x107   :  { %v196_v55 = vpop.f32.mrf.mxu0  ;;  %v220_v56 = vpop.f32.mrf.mxu1 }
 0x108   :  { %301 = vst [vmem:[#allocation9 + $0x18] sm:$0xff] %v285_v57  ;;  %309 = vst [vmem:[#allocation9 + $0x58] sm:$0xff] %v293_v58  ;;  %v286_v61 = vmax.f32 %v196_v55, 0.0  ;;  %v294_v62 = vmax.f32 %v220_v56, 0.0 }
 0x109   :  { %v198_v59 = vpop.f32.mrf.mxu0  ;;  %v222_v60 = vpop.f32.mrf.mxu1 }
 0x10a   :  { %302 = vst [vmem:[#allocation9 + $0x20] sm:$0xff] %v286_v61  ;;  %310 = vst [vmem:[#allocation9 + $0x60] sm:$0xff] %v294_v62  ;;  %v287_v1 = vmax.f32 %v198_v59, 0.0  ;;  %v295_v2 = vmax.f32 %v222_v60, 0.0 }
 0x10b   :  { %v202_v63 = vpop.f32.mrf.mxu0  ;;  %v226_v0 = vpop.f32.mrf.mxu1 }
 0x10c   :  { %303 = vst [vmem:[#allocation9 + $0x28] sm:$0xff] %v287_v1  ;;  %311 = vst [vmem:[#allocation9 + $0x68] sm:$0xff] %v295_v2  ;;  %v288_v5 = vmax.f32 %v202_v63, 0.0  ;;  %v296_v6 = vmax.f32 %v226_v0, 0.0 }
 0x10d   :  { %v204_v3 = vpop.f32.mrf.mxu0  ;;  %v228_v4 = vpop.f32.mrf.mxu1 }
 0x10e   :  { %304 = vst [vmem:[#allocation9 + $0x30] sm:$0xff] %v288_v5  ;;  %312 = vst [vmem:[#allocation9 + $0x70] sm:$0xff] %v296_v6  ;;  %v289_v7 = vmax.f32 %v204_v3, 0.0  ;;  %v297_v8 = vmax.f32 %v228_v4, 0.0 }
 0x110   :  { %305 = vst [vmem:[#allocation9 + $0x38] sm:$0xff] %v289_v7  ;;  %313 = vst [vmem:[#allocation9 + $0x78] sm:$0xff] %v297_v8 }
 0x111   :  { %423 = shalt.err (!%p420_p0)
}
 0x112   :  { %325 = dma.vmem_to_hbm [thread:$0]  %s320_s2, 2048, %s492_s3, [#allocation6], %s442_s21, %s442_s21, %s443_s22  }
 0x113   :  { %436 = dma.done.wait [#allocation6], 2048  }
 0x114   :  { %437 = vsyncadd [#allocation6], 4294965248 }
 0x115   :  { %329 = vsyncpa [#allocation5], 1 }
 0x116   :  { %330 = vsyncpa [#allocation8], 1 }
 0x117   :  { %331 = vsyncpa [#allocation6], 1 }

</bundles_post_ra>
